<compile_context>
chip_gen: v7x
topology: tpu7x:2x2x1
jax: 0.10.0
libtpu: 0.0.40
codegen_flags: <defaults>
</compile_context>

<pallas_src>
import functools

import jax
import jax.numpy as jnp
import numpy as np
from jax import lax
from jax.experimental import pallas as pl
from jax.experimental.pallas import tpu as pltpu


def _conv2d_circular_kernel(x_ref, w_ref, b_ref, o_ref, *,
                            C, H, W, KH, KW, ph, pw):
    """Fused circular-pad + conv for ONE batch image (grid axis = batch).

    x_ref : (1, C, H*W)       flattened input image (spatial on lanes)
    w_ref : (KH*KW, O, C)     per-tap repacked conv weight
    b_ref : (O, 1)            bias
    o_ref : (1, O, H*W)       output (lane-dense minor dim)
    """
    HW = H * W
    O = b_ref.shape[0]
    x = x_ref[0]                               # (C, HW), loaded once

    def circ(v, r):
        # out[:, f] = v[:, (f + r) % HW]  ==  np.roll(v, -r, axis=-1)
        # -> single XLU lane rotation (free slot here), no slice/concat copies.
        s = (-r) % HW
        if s == 0:
            return v
        return pltpu.roll(v, s, 1)

    # Width-wrapped bases: bases[dw][c, i*W + j] = x[c, i, (j + dw) % W].
    # Interior columns come from a flat lane roll by dw; only the W-wrap
    # columns need the alternate roll (dw -/+ W), selected by a mask built
    # in-kernel from one iota (no helper input array).
    bases = {0: x}
    if pw > 0:
        colj = lax.broadcasted_iota(jnp.int32, (1, HW), 1) % W   # (1, HW)
        for dw in range(-pw, pw + 1):
            if dw == 0:
                continue
            if dw > 0:
                bases[dw] = jnp.where(colj >= W - dw, circ(x, dw - W), circ(x, dw))
            else:
                bases[dw] = jnp.where(colj < -dw, circ(x, dw + W), circ(x, dw))

    # Per-tap accumulated MXU matmuls (no materialized im2col matrix);
    # bias folded into the accumulator init.
    acc = jnp.broadcast_to(b_ref[...].astype(jnp.float32), (O, HW))
    tap = 0
    for kh in range(KH):
        dh = kh - ph                            # H wrap == pure flat roll by dh*W
        for kw in range(KW):
            dw = kw - pw
            base = circ(bases[dw], dh * W)      # (C, HW)
            acc = acc + jnp.dot(w_ref[tap], base,
                                preferred_element_type=jnp.float32)
            tap += 1

    o_ref[0] = acc.astype(o_ref.dtype)          # lane-aligned dense store


@functools.partial(jax.jit, static_argnames=("padding",))
def wrapped_conv2d(x_nchw, weight_oihw, bias, padding):
    """Equivalent of WrappedConv2d.forward (circular pad + Conv2d).

    x_nchw      : (N, C, H, W)     float32
    weight_oihw : (O, C, KH, KW)   PyTorch Conv2d weight layout
    bias        : (O,)
    padding     : (ph, pw) = ((KH-1)//2, (KW-1)//2)
    returns     : (N, O, H, W)     NCHW
    """
    N, C, H, W = x_nchw.shape
    O, _, KH, KW = weight_oihw.shape
    ph, pw = padding
    if (H + 2 * ph - KH + 1, W + 2 * pw - KW + 1) != (H, W):
        # TODO(synk): even kernel sizes (output smaller than input) are not
        # wired through this fused same-size layout; the module uses odd K.
        raise NotImplementedError("only odd kernel sizes are supported")

    HW = H * W
    # Free reshapes + tiny one-time parameter repack; no activation-sized
    # transpose/pad ever round-trips HBM outside the kernel.
    x3 = x_nchw.reshape(N, C, HW)
    w3 = jnp.transpose(weight_oihw, (2, 3, 0, 1)).reshape(KH * KW, O, C)
    b2 = bias.reshape(O, 1)

    kernel = functools.partial(_conv2d_circular_kernel,
                               C=C, H=H, W=W, KH=KH, KW=KW, ph=ph, pw=pw)
    out3 = pl.pallas_call(
        kernel,
        out_shape=jax.ShapeDtypeStruct((N, O, HW), x_nchw.dtype),
        grid=(N,),
        in_specs=[
            pl.BlockSpec((1, C, HW), lambda n: (n, 0, 0)),          # per-image
            pl.BlockSpec((KH * KW, O, C), lambda n: (0, 0, 0)),     # resident
            pl.BlockSpec((O, 1), lambda n: (0, 0)),                 # resident
        ],
        out_specs=pl.BlockSpec((1, O, HW), lambda n: (n, 0, 0)),
        compiler_params=pltpu.CompilerParams(
            dimension_semantics=("parallel",)),                     # megacore
    )(x3, w3, b2)
    return out3.reshape(N, O, H, W)


def _circular_pad_nhwc(x, ph, pw):
    if ph > 0:
        x = jnp.concatenate([x[:, -ph:], x, x[:, :ph]], axis=1)
    if pw > 0:
        x = jnp.concatenate([x[:, :, -pw:], x, x[:, :, :pw]], axis=2)
    return x


def _reference_nchw(x_nchw, weight_oihw, bias, padding):
    """Pure-JAX reference: circular pad then valid conv (matches F.pad + Conv2d)."""
    ph, pw = padding
    x_nhwc = jnp.transpose(x_nchw, (0, 2, 3, 1))
    xp = _circular_pad_nhwc(x_nhwc, ph, pw)
    xp_nchw = jnp.transpose(xp, (0, 3, 1, 2))
    out = lax.conv_general_dilated(
        xp_nchw, weight_oihw, window_strides=(1, 1), padding="VALID",
        dimension_numbers=("NCHW", "OIHW", "NCHW"),
        precision=lax.Precision.HIGHEST)
    return out + bias[None, :, None, None]


if __name__ == "__main__":
    # Module config: WrappedConv2d(in_channels=4, out_channels=8, kernel_size=3)
    N, C_in, H, W = 2, 4, 16, 16
    C_out, K = 8, 3
    padding = ((K - 1) // 2, (K - 1) // 2)

    key = jax.random.PRNGKey(0)
    kx, kw, kb = jax.random.split(key, 3)
    x = jax.random.normal(kx, (N, C_in, H, W), dtype=jnp.float32)
    fan_in = C_in * K * K
    bound = 1.0 / np.sqrt(fan_in)
    weight = jax.random.uniform(kw, (C_out, C_in, K, K), jnp.float32,
                                minval=-bound, maxval=bound)
    bias = jax.random.uniform(kb, (C_out,), jnp.float32,
                              minval=-bound, maxval=bound)

    out = wrapped_conv2d(x, weight, bias, padding=padding)
    out = jax.block_until_ready(out)

    ref = _reference_nchw(x, weight, bias, padding)
    assert out.shape == (N, C_out, H, W), out.shape
    # Tolerance accounts for MXU default-precision input rounding on the
    # f32-accumulated per-tap matmuls.
    np.testing.assert_allclose(np.asarray(out), np.asarray(ref),
                               rtol=5e-3, atol=5e-3)
    print("KERNEL_OK")
</pallas_src>

<mosaic_0001>
module attributes {stable_mosaic.version = 11 : i64} {
  func.func @_conv2d_circular_kernel(%arg0: i32, %arg1: memref<1x4x256xf32, #tpu.memory_space<vmem>>, %arg2: memref<9x8x4xf32, #tpu.memory_space<vmem>>, %arg3: memref<8x1xf32, #tpu.memory_space<vmem>>, %arg4: memref<1x8x256xf32, #tpu.memory_space<vmem>>) attributes {dimension_semantics = [#tpu.dimension_semantics<parallel>], iteration_bounds = array<i64: 2>, scalar_prefetch = 0 : i64, scratch_operands = 0 : i64, tpu.core_type = #tpu.core_type<tc>, window_params = [{transform_indices = @transform_0, window_bounds = array<i64: 1, 4, 256>}, {pipeline_mode = #tpu.pipeline_mode<synchronous>, transform_indices = @transform_1, window_bounds = array<i64: 9, 8, 4>}, {pipeline_mode = #tpu.pipeline_mode<synchronous>, transform_indices = @transform_2, window_bounds = array<i64: 8, 1>}, {transform_indices = @transform_3, window_bounds = array<i64: 1, 8, 256>}]} {
    %c0 = arith.constant 0 : index
    %c0_0 = arith.constant 0 : index
    %c0_1 = arith.constant 0 : index
    %0 = vector.load %arg1[%c0, %c0_0, %c0_1] : memref<1x4x256xf32, #tpu.memory_space<vmem>>, vector<1x4x256xf32>
    %1 = vector.shape_cast %0 : vector<1x4x256xf32> to vector<4x256xf32>
    %2 = tpu.iota {dimensions = array<i32: 1>} : vector<1x256xi32>
    %c16_i32 = arith.constant 16 : i32
    %c0_i32 = arith.constant 0 : i32
    %3 = arith.cmpi eq, %c16_i32, %c0_i32 : i32
    %c1_i32 = arith.constant 1 : i32
    %4 = arith.select %3, %c1_i32, %c16_i32 : i32
    %5 = vector.broadcast %4 : i32 to vector<1x256xi32>
    %6 = arith.remsi %2, %5 : vector<1x256xi32>
    %c0_i32_2 = arith.constant 0 : i32
    %7 = vector.broadcast %c0_i32_2 : i32 to vector<1x256xi32>
    %8 = arith.cmpi ne, %6, %7 : vector<1x256xi32>
    %c0_i32_3 = arith.constant 0 : i32
    %9 = vector.broadcast %c0_i32_3 : i32 to vector<1x256xi32>
    %10 = arith.cmpi slt, %6, %9 : vector<1x256xi32>
    %c0_i32_4 = arith.constant 0 : i32
    %11 = arith.cmpi slt, %4, %c0_i32_4 : i32
    %12 = vector.broadcast %11 : i1 to vector<1x256xi1>
    %13 = vector.broadcast %12 : vector<1x256xi1> to vector<1x256xi1>
    %14 = arith.xori %10, %13 : vector<1x256xi1>
    %15 = arith.andi %14, %8 : vector<1x256xi1>
    %16 = vector.broadcast %4 : i32 to vector<1x256xi32>
    %17 = arith.addi %6, %16 : vector<1x256xi32>
    %18 = arith.select %15, %17, %6 : vector<1x256xi1>, vector<1x256xi32>
    %c1_i32_5 = arith.constant 1 : i32
    %19 = vector.broadcast %c1_i32_5 : i32 to vector<1x256xi32>
    %20 = arith.cmpi slt, %18, %19 : vector<1x256xi32>
    %c241_i32 = arith.constant 241 : i32
    %21 = tpu.dynamic_rotate %1 by %c241_i32 dim 1 : vector<4x256xf32>, i32 -> vector<4x256xf32>
    %c1_i32_6 = arith.constant 1 : i32
    %22 = tpu.dynamic_rotate %1 by %c1_i32_6 dim 1 : vector<4x256xf32>, i32 -> vector<4x256xf32>
    %23 = vector.shape_cast %20 : vector<1x256xi1> to vector<1x256xi1>
    %24 = vector.broadcast %23 : vector<1x256xi1> to vector<4x256xi1>
    %25 = arith.select %24, %21, %22 : vector<4x256xi1>, vector<4x256xf32>
    %c15_i32 = arith.constant 15 : i32
    %26 = vector.broadcast %c15_i32 : i32 to vector<1x256xi32>
    %27 = arith.cmpi sge, %18, %26 : vector<1x256xi32>
    %c15_i32_7 = arith.constant 15 : i32
    %28 = tpu.dynamic_rotate %1 by %c15_i32_7 dim 1 : vector<4x256xf32>, i32 -> vector<4x256xf32>
    %c255_i32 = arith.constant 255 : i32
    %29 = tpu.dynamic_rotate %1 by %c255_i32 dim 1 : vector<4x256xf32>, i32 -> vector<4x256xf32>
    %30 = vector.shape_cast %27 : vector<1x256xi1> to vector<1x256xi1>
    %31 = vector.broadcast %30 : vector<1x256xi1> to vector<4x256xi1>
    %32 = arith.select %31, %28, %29 : vector<4x256xi1>, vector<4x256xf32>
    %c0_8 = arith.constant 0 : index
    %c0_9 = arith.constant 0 : index
    %33 = vector.load %arg3[%c0_8, %c0_9] : memref<8x1xf32, #tpu.memory_space<vmem>>, vector<8x1xf32>
    %34 = vector.shape_cast %33 : vector<8x1xf32> to vector<8x1xf32>
    %35 = vector.broadcast %34 : vector<8x1xf32> to vector<8x256xf32>
    %c16_i32_10 = arith.constant 16 : i32
    %36 = tpu.dynamic_rotate %25 by %c16_i32_10 dim 1 : vector<4x256xf32>, i32 -> vector<4x256xf32>
    %c0_11 = arith.constant 0 : index
    %c0_12 = arith.constant 0 : index
    %c0_13 = arith.constant 0 : index
    %37 = vector.load %arg2[%c0_11, %c0_12, %c0_13] : memref<9x8x4xf32, #tpu.memory_space<vmem>>, vector<1x8x4xf32>
    %38 = vector.shape_cast %37 : vector<1x8x4xf32> to vector<8x4xf32>
    %cst = arith.constant dense<0.000000e+00> : vector<8x256xf32>
    %39 = tpu.matmul %38, %36, %cst {dimension_numbers = #tpu.dot_dimension_numbers<[1], [0], [0], [1], [0, 0, 1, 1], [], []>} : vector<8x4xf32>, vector<4x256xf32>, vector<8x256xf32> -> vector<8x256xf32>
    %40 = arith.addf %35, %39 : vector<8x256xf32>
    %c16_i32_14 = arith.constant 16 : i32
    %41 = tpu.dynamic_rotate %1 by %c16_i32_14 dim 1 : vector<4x256xf32>, i32 -> vector<4x256xf32>
    %c1 = arith.constant 1 : index
    %c0_15 = arith.constant 0 : index
    %c0_16 = arith.constant 0 : index
    %42 = vector.load %arg2[%c1, %c0_15, %c0_16] : memref<9x8x4xf32, #tpu.memory_space<vmem>>, vector<1x8x4xf32>
    %43 = vector.shape_cast %42 : vector<1x8x4xf32> to vector<8x4xf32>
    %cst_17 = arith.constant dense<0.000000e+00> : vector<8x256xf32>
    %44 = tpu.matmul %43, %41, %cst_17 {dimension_numbers = #tpu.dot_dimension_numbers<[1], [0], [0], [1], [0, 0, 1, 1], [], []>} : vector<8x4xf32>, vector<4x256xf32>, vector<8x256xf32> -> vector<8x256xf32>
    %45 = arith.addf %40, %44 : vector<8x256xf32>
    %c16_i32_18 = arith.constant 16 : i32
    %46 = tpu.dynamic_rotate %32 by %c16_i32_18 dim 1 : vector<4x256xf32>, i32 -> vector<4x256xf32>
    %c2 = arith.constant 2 : index
    %c0_19 = arith.constant 0 : index
    %c0_20 = arith.constant 0 : index
    %47 = vector.load %arg2[%c2, %c0_19, %c0_20] : memref<9x8x4xf32, #tpu.memory_space<vmem>>, vector<1x8x4xf32>
    %48 = vector.shape_cast %47 : vector<1x8x4xf32> to vector<8x4xf32>
    %cst_21 = arith.constant dense<0.000000e+00> : vector<8x256xf32>
    %49 = tpu.matmul %48, %46, %cst_21 {dimension_numbers = #tpu.dot_dimension_numbers<[1], [0], [0], [1], [0, 0, 1, 1], [], []>} : vector<8x4xf32>, vector<4x256xf32>, vector<8x256xf32> -> vector<8x256xf32>
    %50 = arith.addf %45, %49 : vector<8x256xf32>
    %c3 = arith.constant 3 : index
    %c0_22 = arith.constant 0 : index
    %c0_23 = arith.constant 0 : index
    %51 = vector.load %arg2[%c3, %c0_22, %c0_23] : memref<9x8x4xf32, #tpu.memory_space<vmem>>, vector<1x8x4xf32>
    %52 = vector.shape_cast %51 : vector<1x8x4xf32> to vector<8x4xf32>
    %cst_24 = arith.constant dense<0.000000e+00> : vector<8x256xf32>
    %53 = tpu.matmul %52, %25, %cst_24 {dimension_numbers = #tpu.dot_dimension_numbers<[1], [0], [0], [1], [0, 0, 1, 1], [], []>} : vector<8x4xf32>, vector<4x256xf32>, vector<8x256xf32> -> vector<8x256xf32>
    %54 = arith.addf %50, %53 : vector<8x256xf32>
    %c4 = arith.constant 4 : index
    %c0_25 = arith.constant 0 : index
    %c0_26 = arith.constant 0 : index
    %55 = vector.load %arg2[%c4, %c0_25, %c0_26] : memref<9x8x4xf32, #tpu.memory_space<vmem>>, vector<1x8x4xf32>
    %56 = vector.shape_cast %55 : vector<1x8x4xf32> to vector<8x4xf32>
    %cst_27 = arith.constant dense<0.000000e+00> : vector<8x256xf32>
    %57 = tpu.matmul %56, %1, %cst_27 {dimension_numbers = #tpu.dot_dimension_numbers<[1], [0], [0], [1], [0, 0, 1, 1], [], []>} : vector<8x4xf32>, vector<4x256xf32>, vector<8x256xf32> -> vector<8x256xf32>
    %58 = arith.addf %54, %57 : vector<8x256xf32>
    %c5 = arith.constant 5 : index
    %c0_28 = arith.constant 0 : index
    %c0_29 = arith.constant 0 : index
    %59 = vector.load %arg2[%c5, %c0_28, %c0_29] : memref<9x8x4xf32, #tpu.memory_space<vmem>>, vector<1x8x4xf32>
    %60 = vector.shape_cast %59 : vector<1x8x4xf32> to vector<8x4xf32>
    %cst_30 = arith.constant dense<0.000000e+00> : vector<8x256xf32>
    %61 = tpu.matmul %60, %32, %cst_30 {dimension_numbers = #tpu.dot_dimension_numbers<[1], [0], [0], [1], [0, 0, 1, 1], [], []>} : vector<8x4xf32>, vector<4x256xf32>, vector<8x256xf32> -> vector<8x256xf32>
    %62 = arith.addf %58, %61 : vector<8x256xf32>
    %c240_i32 = arith.constant 240 : i32
    %63 = tpu.dynamic_rotate %25 by %c240_i32 dim 1 : vector<4x256xf32>, i32 -> vector<4x256xf32>
    %c6 = arith.constant 6 : index
    %c0_31 = arith.constant 0 : index
    %c0_32 = arith.constant 0 : index
    %64 = vector.load %arg2[%c6, %c0_31, %c0_32] : memref<9x8x4xf32, #tpu.memory_space<vmem>>, vector<1x8x4xf32>
    %65 = vector.shape_cast %64 : vector<1x8x4xf32> to vector<8x4xf32>
    %cst_33 = arith.constant dense<0.000000e+00> : vector<8x256xf32>
    %66 = tpu.matmul %65, %63, %cst_33 {dimension_numbers = #tpu.dot_dimension_numbers<[1], [0], [0], [1], [0, 0, 1, 1], [], []>} : vector<8x4xf32>, vector<4x256xf32>, vector<8x256xf32> -> vector<8x256xf32>
    %67 = arith.addf %62, %66 : vector<8x256xf32>
    %c240_i32_34 = arith.constant 240 : i32
    %68 = tpu.dynamic_rotate %1 by %c240_i32_34 dim 1 : vector<4x256xf32>, i32 -> vector<4x256xf32>
    %c7 = arith.constant 7 : index
    %c0_35 = arith.constant 0 : index
    %c0_36 = arith.constant 0 : index
    %69 = vector.load %arg2[%c7, %c0_35, %c0_36] : memref<9x8x4xf32, #tpu.memory_space<vmem>>, vector<1x8x4xf32>
    %70 = vector.shape_cast %69 : vector<1x8x4xf32> to vector<8x4xf32>
    %cst_37 = arith.constant dense<0.000000e+00> : vector<8x256xf32>
    %71 = tpu.matmul %70, %68, %cst_37 {dimension_numbers = #tpu.dot_dimension_numbers<[1], [0], [0], [1], [0, 0, 1, 1], [], []>} : vector<8x4xf32>, vector<4x256xf32>, vector<8x256xf32> -> vector<8x256xf32>
    %72 = arith.addf %67, %71 : vector<8x256xf32>
    %c240_i32_38 = arith.constant 240 : i32
    %73 = tpu.dynamic_rotate %32 by %c240_i32_38 dim 1 : vector<4x256xf32>, i32 -> vector<4x256xf32>
    %c8 = arith.constant 8 : index
    %c0_39 = arith.constant 0 : index
    %c0_40 = arith.constant 0 : index
    %74 = vector.load %arg2[%c8, %c0_39, %c0_40] : memref<9x8x4xf32, #tpu.memory_space<vmem>>, vector<1x8x4xf32>
    %75 = vector.shape_cast %74 : vector<1x8x4xf32> to vector<8x4xf32>
    %cst_41 = arith.constant dense<0.000000e+00> : vector<8x256xf32>
    %76 = tpu.matmul %75, %73, %cst_41 {dimension_numbers = #tpu.dot_dimension_numbers<[1], [0], [0], [1], [0, 0, 1, 1], [], []>} : vector<8x4xf32>, vector<4x256xf32>, vector<8x256xf32> -> vector<8x256xf32>
    %77 = arith.addf %72, %76 : vector<8x256xf32>
    %c0_42 = arith.constant 0 : index
    %c0_43 = arith.constant 0 : index
    %c0_44 = arith.constant 0 : index
    %78 = vector.load %arg4[%c0_42, %c0_43, %c0_44] : memref<1x8x256xf32, #tpu.memory_space<vmem>>, vector<1x8x256xf32>
    %79 = vector.shape_cast %78 : vector<1x8x256xf32> to vector<8x256xf32>
    %80 = vector.shape_cast %77 : vector<8x256xf32> to vector<1x8x256xf32>
    tpu.vector_store %arg4[%c0_42, %c0_43, %c0_44], %80 {strides = array<i32>} : memref<1x8x256xf32, #tpu.memory_space<vmem>>, vector<1x8x256xf32>,
    return
  }
  func.func @transform_0(%arg0: i32) -> (i32, i32, i32) {
    %c0_i32 = arith.constant 0 : i32
    %c0_i32_0 = arith.constant 0 : i32
    %c0_i32_1 = arith.constant 0 : i32
    return %arg0, %c0_i32, %c0_i32_0 : i32, i32, i32
  }
  func.func @transform_1(%arg0: i32) -> (i32, i32, i32) {
    %c0_i32 = arith.constant 0 : i32
    %c0_i32_0 = arith.constant 0 : i32
    %c0_i32_1 = arith.constant 0 : i32
    %c0_i32_2 = arith.constant 0 : i32
    return %c0_i32, %c0_i32_0, %c0_i32_1 : i32, i32, i32
  }
  func.func @transform_2(%arg0: i32) -> (i32, i32) {
    %c0_i32 = arith.constant 0 : i32
    %c0_i32_0 = arith.constant 0 : i32
    %c0_i32_1 = arith.constant 0 : i32
    return %c0_i32, %c0_i32_0 : i32, i32
  }
  func.func @transform_3(%arg0: i32) -> (i32, i32, i32) {
    %c0_i32 = arith.constant 0 : i32
    %c0_i32_0 = arith.constant 0 : i32
    %c0_i32_1 = arith.constant 0 : i32
    return %arg0, %c0_i32, %c0_i32_0 : i32, i32, i32
  }
}

</mosaic_0001>

<bundles_post_ra>
// kernel: wrapped_conv2d.1
= control target key start
LH: loop header
LB: loop body
LE: loop exit
PB: predicated region body
PF: predicated region fallthrough
CT: control target
= control target key end

     0   :  { %s1222_s12 = smov 0   ;;  %s1373_s0 = inlined_call_operand.vmem [shape: f32[2,4,256], index: 0, kind: input, shape index: {}]   ;;  %s1374_s1 = inlined_call_operand.vmem [shape: f32[9,8,4], index: 1, kind: input, shape index: {}]   ;;  %s1375_s2 = inlined_call_operand.vmem [shape: f32[8,1], index: 2, kind: input, shape index: {}]   ;;  %s1376_s3 = inlined_call_operand.vmem [shape: f32[2,8,256], index: 3, kind: output, shape index: {}]  }
   0x1 LB: > { %s1102_s13 = sadd.s32 4294967295, %s1192_s12   ;;  %p1106_p0 = scmp.ge.s32.totalorder %s1192_s12, 1  ;;  %s1192_s12 = sphi %s1222_s12, %s13_s12  }
   0x2   : > { %p137_p1 = scmp.lt.s32.totalorder %s1192_s12, 3 }
   0x4   : > { %p138_p2 = pnand %p1106_p0, %p137_p1 }
   0x5   : > { %p161_p3 = scmp.lt.s32.totalorder (!%p138_p2), %s1102_s13, 1  ;;  %vm264_vm0 = vcmask (!%p138_p2), 1043456   ;;  %s1194_s18 = smov (!%p138_p2), 1   ;;  %v1196_v2 = vmov (!%p138_p2), 0.0   ;;  %vm260_vm1 = vcmask (!%p138_p2), 31744   ;;  %v1126_v3 = vld [vmem:[%s1374_s1 + $0x20] sm:$0xff] (!%p138_p2)  ;;  %v172_v4 = vlaneseq (!%p138_p2) }
   0x6   : > { %141 = sbr.rel (%p138_p2) target bundleno = 498 (0x1f2), region = 32  ;;  %s1195_s19 = smov (!%p138_p2), 113   ;;  %681 = vmatprep.mubr.f32.mxu0 (!%p138_p2), %v1196_v2  ;;  %335 = vmatprep.mubr.f32.mxu1 (!%p138_p2), %v1196_v2  ;;  %v1130_v29 = vld [vmem:[%s1374_s1 + $0x28] sm:$0xff] (!%p138_p2)  ;;  %v1201_v30 = vmov (!%p138_p2), 0   ;;  %v246_v31 = vld [vmem:[%s1375_s2] sm:$0xff] (!%p138_p2)  ;;  %v1134_v46 = vld [vmem:[%s1374_s1 + $0x30] sm:$0xff] (!%p138_p2) }
   0x7   : > { %s1197_s22 = smov (!%p138_p2), 15   ;;  %s1198_s23 = smov (!%p138_p2), 127   ;;  %v1261_v5 = vand.u32 (!%p138_p2), 127, %v172_v4  ;;  %1184 = vset.pattern.permute.xlu0 (!%p138_p2), %v1201_v30  ;;  %v259_v36 = vld [vmem:[%s1374_s1] sm:$0xff] (!%p138_p2)  ;;  %v1114_v45 = vld [vmem:[%s1374_s1 + $0x8] sm:$0xff] (!%p138_p2)  ;;  %v1118_v55 = vld [vmem:[%s1374_s1 + $0x10] sm:$0xff] (!%p138_p2) }
   0x8   : > { %s1199_s24 = smov (!%p138_p2), 16   ;;  %s1200_s25 = smov (!%p138_p2), 112   ;;  %v1138_v56 = vld [vmem:[%s1374_s1 + $0x38] sm:$0xff] (!%p138_p2)  ;;  %v1142_v62 = vld [vmem:[%s1374_s1 + $0x40] sm:$0xff] (!%p138_p2) }
   0x9   : > { %v174_v6 = vadd.s32 (!%p138_p2), 128, %v1261_v5  ;;  %v179_v8 = vand.u32 (!%p138_p2), 15, %v1261_v5  ;;  %vm215_vm2 = vcmp.lt.s32.totalorder (!%p138_p2), %v1261_v5, 1  ;;  %vm208_vm3 = vcmp.lt.s32.totalorder (!%p138_p2), %v1261_v5, 113  ;;  %v1122_v61 = vld [vmem:[%s1374_s1 + $0x18] sm:$0xff] (!%p138_p2) }
   0xa   : > { %vm230_vm6 = vcmp.lt.s32.totalorder (!%p138_p2), %v1261_v5, 15  ;;  %vm237_vm7 = vcmp.lt.s32.totalorder (!%p138_p2), %v1261_v5, 127  ;;  %vm256_vm10 = vcmp.lt.s32.totalorder (!%p138_p2), %v1261_v5, 16  ;;  %vm778_vm11 = vcmp.lt.s32.totalorder (!%p138_p2), %v1261_v5, 112 }
   0xb   : > { %v186_v7 = vand.u32 (!%p138_p2), 15, %v174_v6  ;;  %vm199_vm5 = vcmp.lt.s32.totalorder (!%p138_p2), %v179_v8, 1  ;;  %vm224_vm8 = vcmp.ge.s32.totalorder (!%p138_p2), %v179_v8, 15 }
   0xd   : > { %s1378_s13 = smov (!%p161_p3, %s1102_s13), 1  ;;  %vm200_vm4 = vcmp.lt.s32.totalorder %v186_v7, 1  ;;  %vm225_vm9 = vcmp.ge.s32.totalorder %v186_v7, 15 }
   0xe   : > { %s1148_s14 = sshll.u32 %s1378_s13, 3 }
   0xf   : > { %s165_s17 = scalar_lea.vmem %s1373_s0, %s1148_s14 }
  0x10   : > { %v1236_v0 = vld [vmem:[%s165_s17] sm:$0xff] }
  0x11   : > { %211 = vrot.lane.b32.xlu1 %v1236_v0, %s1194_s18  ;;  %204 = vrot.lane.b32.xlu0 %v1236_v0, %s1195_s19  ;;  %v1242_v1 = vcombine.high %v1236_v0, %v1236_v0 }
  0x13   : > { %1127 = vmatprep.subr.msk.mxu0 %vm264_vm0, %v1242_v1 }
  0x14   : > { %1128 = vmatpush1.msk.msra.mxu0 %vm264_vm0, %v1236_v0 }
  0x15   : > { %213 = vrot.lane.b32.xlu1 %v1242_v1, %s1194_s18  ;;  %206 = vrot.lane.b32.xlu0 %v1242_v1, %s1195_s19  ;;  %s1149_s19 = sshll.u32 %s1378_s13, 4 }
  0x16   : > { %1129 = vmatmul.mubr.msk.f32.vlgmr.msra.gmra.mrb[0].mxu0 %vm260_vm1, %v1126_v3 }
  0x17   : > { %765 = vmatprep.mubr.f32.mxu0 %v1196_v2 }
  0x19   : > { %228 = vrot.lane.b32.xlu1 %v1242_v1, %s1197_s22  ;;  %226 = vrot.lane.b32.xlu0 %v1236_v0, %s1197_s22  ;;  %s170_s22 = scalar_lea.vmem %s1376_s3, %s1149_s19 }
  0x1d   : > { %235 = vrot.lane.b32.xlu1 %v1242_v1, %s1198_s23  ;;  %233 = vrot.lane.b32.xlu0 %v1236_v0, %s1198_s23 }
  0x83   : > { %v212_v9 = vpop.permute.xlu1 %211  ;;  %v205_v10 = vpop.permute.xlu0 %204 }
  0x87   : > { %v214_v11 = vpop.permute.xlu1 %213  ;;  %v207_v12 = vpop.permute.xlu0 %206 }
  0x88   : > { %v216_v13 = vsel %vm215_vm2, %v212_v9, %v214_v11  ;;  %v217_v14 = vsel %vm215_vm2, %v214_v11, %v212_v9  ;;  %v209_v15 = vsel %vm208_vm3, %v205_v10, %v207_v12  ;;  %v210_v16 = vsel %vm208_vm3, %v207_v12, %v205_v10 }
  0x89   : > { %v1267_v17 = vsel %vm200_vm4, %v210_v16, %v216_v13  ;;  %v1269_v18 = vsel %vm199_vm5, %v209_v15, %v217_v14 }
  0x8a   : > { %254 = vrot.lane.b32.xlu1 %v1267_v17, %s1199_s24  ;;  %252 = vrot.lane.b32.xlu0 %v1269_v18, %s1199_s24 }
  0x8b   : > { %v229_v19 = vpop.permute.xlu1 %228  ;;  %v227_v20 = vpop.permute.xlu0 %226 }
  0x8c   : > { %v231_v21 = vsel %vm230_vm6, %v227_v20, %v229_v19  ;;  %v232_v22 = vsel %vm230_vm6, %v229_v19, %v227_v20 }
  0x8e   : > { %346 = vrot.lane.b32.xlu1 %v1242_v1, %s1199_s24  ;;  %344 = vrot.lane.b32.xlu0 %v1236_v0, %s1199_s24 }
  0x8f   : > { %v236_v23 = vpop.permute.xlu1 %235  ;;  %v234_v24 = vpop.permute.xlu0 %233 }
  0x90   : > { %v238_v25 = vsel %vm237_vm7, %v234_v24, %v236_v23  ;;  %v239_v26 = vsel %vm237_vm7, %v236_v23, %v234_v24 }
  0x91   : > { %v244_v27 = vsel %vm224_vm8, %v232_v22, %v238_v25  ;;  %v245_v28 = vsel %vm225_vm9, %v231_v21, %v239_v26 }
  0x92   : > { %776 = vrot.lane.b32.xlu1 %v1267_v17, %s1200_s25  ;;  %774 = vrot.lane.b32.xlu0 %v1269_v18, %s1200_s25 }
  0x93   : > { %1131 = vmatprep.subr.msk.mxu0 %vm264_vm0, %v245_v28 }
  0x94   : > { %1132 = vmatpush1.msk.msra.mxu0 %vm264_vm0, %v244_v27 }
  0x95   : > { %1133 = vmatmul.mubr.msk.f32.vlgmr.msra.gmra.mrb[0].mxu0 %vm260_vm1, %v1130_v29 }
  0x96   : > { %436 = vrot.lane.b32.xlu1 %v245_v28, %s1199_s24  ;;  %434 = vrot.lane.b32.xlu0 %v244_v27, %s1199_s24 }
  0x97   : > { %856 = vmatprep.mubr.f32.mxu0 %v1196_v2 }
  0x9a   : > { %867 = vrot.lane.b32.xlu1 %v1242_v1, %s1200_s25  ;;  %865 = vrot.lane.b32.xlu0 %v1236_v0, %s1200_s25 }
  0x9e   : > { %957 = vrot.lane.b32.xlu1 %v245_v28, %s1200_s25  ;;  %955 = vrot.lane.b32.xlu0 %v244_v27, %s1200_s25 }
  0xa2   : > { %249 = vperm.xlu0 %1184, %v246_v31  }
  0xfc   : > { %v255_v32 = vpop.permute.xlu1 %254  ;;  %v253_v33 = vpop.permute.xlu0 %252 }
  0xfd   : > { %v257_v34 = vsel %vm256_vm10, %v253_v33, %v255_v32  ;;  %v258_v35 = vsel %vm256_vm10, %v255_v32, %v253_v33 }
  0xfe   : > { %1111 = vmatprep.subr.msk.mxu1 %vm264_vm0, %v257_v34 }
  0xff   : > { %1112 = vmatpush1.msk.msra.mxu1 %vm264_vm0, %v258_v35 }
 0x100   : > { %v347_v37 = vpop.permute.xlu1 %346  ;;  %1113 = vmatmul.mubr.msk.f32.vlgmr.msra.gmra.mrb[0].mxu1 %vm260_vm1, %v259_v36  ;;  %v345_v38 = vpop.permute.xlu0 %344 }
 0x101   : > { %v348_v39 = vsel %vm256_vm10, %v345_v38, %v347_v37  ;;  %v349_v40 = vsel %vm256_vm10, %v347_v37, %v345_v38  ;;  %425 = vmatprep.mubr.f32.mxu1 %v1196_v2 }
 0x102   : > { %1115 = vmatprep.subr.msk.mxu1 %vm264_vm0, %v348_v39 }
 0x103   : > { %1116 = vmatpush1.msk.msra.mxu1 %vm264_vm0, %v349_v40 }
 0x104   : > { %v777_v41 = vpop.permute.xlu1 %776  ;;  %v775_v42 = vpop.permute.xlu0 %774 }
 0x105   : > { %v779_v43 = vsel %vm778_vm11, %v775_v42, %v777_v41  ;;  %v780_v44 = vsel %vm778_vm11, %v777_v41, %v775_v42 }
 0x106   : > { %1135 = vmatprep.subr.msk.mxu0 %vm264_vm0, %v780_v44 }
 0x107   : > { %1136 = vmatpush1.msk.msra.mxu0 %vm264_vm0, %v779_v43 }
 0x108   : > { %v437_v47 = vpop.permute.xlu1 %436  ;;  %1117 = vmatmul.mubr.msk.f32.vlgmr.msra.gmra.mrb[0].mxu1 %vm260_vm1, %v1114_v45  ;;  %v435_v48 = vpop.permute.xlu0 %434  ;;  %1137 = vmatmul.mubr.msk.f32.vlgmr.msra.gmra.mrb[0].mxu0 %vm260_vm1, %v1134_v46 }
 0x109   : > { %v438_v49 = vsel %vm256_vm10, %v435_v48, %v437_v47  ;;  %v439_v50 = vsel %vm256_vm10, %v437_v47, %v435_v48  ;;  %515 = vmatprep.mubr.f32.mxu1 %v1196_v2  ;;  %946 = vmatprep.mubr.f32.mxu0 %v1196_v2 }
 0x10a   : > { %1119 = vmatprep.subr.msk.mxu1 %vm264_vm0, %v438_v49 }
 0x10b   : > { %1120 = vmatpush1.msk.msra.mxu1 %vm264_vm0, %v439_v50 }
 0x10c   : > { %v868_v51 = vpop.permute.xlu1 %867  ;;  %1123 = vmatprep.subr.msk.mxu1 %vm264_vm0, %v1267_v17  ;;  %v866_v52 = vpop.permute.xlu0 %865 }
 0x10d   : > { %v869_v53 = vsel %vm778_vm11, %v866_v52, %v868_v51  ;;  %v870_v54 = vsel %vm778_vm11, %v868_v51, %v866_v52 }
 0x10e   : > { %1139 = vmatprep.subr.msk.mxu0 %vm264_vm0, %v870_v54 }
 0x10f   : > { %1140 = vmatpush1.msk.msra.mxu0 %vm264_vm0, %v869_v53 }
 0x110   : > { %v958_v57 = vpop.permute.xlu1 %957  ;;  %1121 = vmatmul.mubr.msk.f32.vlgmr.msra.gmra.mrb[0].mxu1 %vm260_vm1, %v1118_v55  ;;  %v956_v58 = vpop.permute.xlu0 %955  ;;  %1141 = vmatmul.mubr.msk.f32.vlgmr.msra.gmra.mrb[0].mxu0 %vm260_vm1, %v1138_v56 }
 0x111   : > { %1124 = vmatpush1.msk.msra.mxu1 %vm264_vm0, %v1269_v18  ;;  %v959_v59 = vsel %vm778_vm11, %v956_v58, %v958_v57  ;;  %v960_v60 = vsel %vm778_vm11, %v958_v57, %v956_v58  ;;  %599 = vmatprep.mubr.f32.mxu1 %v1196_v2 }
 0x112   : > { %1143 = vmatprep.subr.msk.mxu0 %vm264_vm0, %v960_v60  ;;  %1036 = vmatprep.mubr.f32.mxu0 %v1196_v2 }
 0x113   : > { %1144 = vmatpush1.msk.msra.mxu0 %vm264_vm0, %v959_v59 }
 0x118   : > { %1125 = vmatmul.mubr.msk.f32.vlgmr.msra.gmra.mrb[0].mxu1 %vm260_vm1, %v1122_v61  ;;  %1145 = vmatmul.mubr.msk.f32.vlgmr.msra.gmra.mrb[0].mxu0 %vm260_vm1, %v1142_v62 }
 0x121   : > { %v250_v63 = vpop.permute.xlu0 %249 }
 0x1eb   : > { %v601_v0 = vpop.f32.mrb[0].mxu1  ;;  %v1038_v1 = vpop.f32.mrb[0].mxu0 }
 0x1ec   : > { %v1150_v3 = vadd.f32 %v601_v0, %v250_v63  ;;  %v603_v2 = vpop.f32.mrb[1].mxu1  ;;  %v1040_v4 = vpop.f32.mrb[1].mxu0 }
 0x1ed   : > { %v1152_v5 = vadd.f32 %v603_v2, %v250_v63 }
 0x1ee   : > { %v1151_v6 = vadd.f32 %v1150_v3, %v1038_v1 }
 0x1ef   : > { %v1153_v7 = vadd.f32 %v1152_v5, %v1040_v4 }
 0x1f0   : > { %1045 = vst [vmem:[%s170_s22] sm:$0xff] %v1151_v6 }
 0x1f1   : > { %1046 = vst [vmem:[%s170_s22 + $0x8] sm:$0xff] %v1153_v7 }
 0x1f2 PF: > { %s13_s12 = sadd.s32 1, %s1192_s12  }
 0x1f3   : > { %p10_p4 = scmp.ge.s32.totalorder %s13_s12, 4  }
 0x1f5   :  { %12 = sbr.rel (!%p10_p4) target bundleno = 1 (0x1), region = 70 }

</bundles_post_ra>
